<compile_context>
chip_gen: v7x
topology: tpu7x:2x2x1
jax: 0.10.0
libtpu: 0.0.40
codegen_flags: <defaults>
</compile_context>

<pallas_src>
import jax
import jax.numpy as jnp
from jax.experimental import pallas as pl
from jax.experimental.pallas import tpu as pltpu

# Module hyper-parameters (the PyTorch source leaves D_in/H/D_out free).
D_IN = 32
H = 64
D_OUT = 16
BATCH = 8


def _mlp_softmax_kernel(xt_ref, w1t_ref, b1_ref, w2t_ref, b2_ref, ot_ref):
    """Fused forward pass on one (transposed) batch tile.

    xt_ref : (D_in, tb)  bf16   x^T tile
    w1t_ref: (H, D_in)   bf16   W1^T
    b1_ref : (H, 1)      f32
    w2t_ref: (D_out, H)  bf16   W2^T
    b2_ref : (D_out, 1)  f32    b2_eff^T (already contains sum(useless) @ W2)
    ot_ref : (D_out, tb) f32    softmax(logits)^T  (batch on lanes)
    """
    xt = xt_ref[...]
    w1t = w1t_ref[...]
    w2t = w2t_ref[...]
    b1 = b1_ref[...]
    b2 = b2_ref[...]

    # h^T = relu(W1^T @ x^T + b1)   -- f32 accumulation, f32 elementwise
    h = jnp.dot(w1t, xt, preferred_element_type=jnp.float32) + b1      # (H, tb)
    h = jnp.maximum(h, 0.0)

    # logits^T = W2^T @ h^T + b2_eff^T   -- bf16 operands, f32 accumulation
    logits = jnp.dot(w2t, h.astype(w2t.dtype),
                     preferred_element_type=jnp.float32) + b2          # (D_out, tb)

    # softmax over the class axis (sublane axis here); exact f32 division so
    # rows sum to 1 to f32 precision.
    m = jnp.max(logits, axis=0, keepdims=True)
    e = jnp.exp(logits - m)
    denom = jnp.sum(e, axis=0, keepdims=True)
    ot_ref[...] = (e / denom).astype(ot_ref.dtype)


def my_module_forward(x, w1, b1, useless_biases, w2, b2, *, batch_tile=2048):
    """x: (B, D_in) float32 -> (B, D_out) float32 softmax probabilities."""
    B, d_in = x.shape
    h_dim = w1.shape[1]
    d_out = w2.shape[1]

    # --- host-side algebraic folding / packing (pure glue, fused by XLA) ------
    ub = jnp.sum(jnp.stack(useless_biases), axis=0)                    # (1, H)
    b2_eff = (ub @ w2 + b2.reshape(1, d_out)).T.astype(jnp.float32)    # (D_out, 1)
    b1c = b1.reshape(h_dim, 1).astype(jnp.float32)                     # (H, 1)

    # bf16 matmul operands (accumulation stays f32 inside the kernel).
    xt = x.T.astype(jnp.bfloat16)                                      # (D_in, B)
    w1t = w1.T.astype(jnp.bfloat16)                                    # (H, D_in)
    w2t = w2.T.astype(jnp.bfloat16)                                    # (D_out, H)

    # --- batch tiling ---------------------------------------------------------
    # Small B: single program, whole arrays resident (block == full array dims).
    # Large B: 128-aligned lane tiles, cdiv grid (masked last tile), so a
    # non-divisible B never falls back to one giant whole-batch block.
    if B > batch_tile:
        assert batch_tile % 128 == 0, "batch_tile must be a multiple of 128"
        tb = batch_tile
    else:
        tb = B
    grid = (pl.cdiv(B, tb),)

    out_t = pl.pallas_call(
        _mlp_softmax_kernel,
        out_shape=jax.ShapeDtypeStruct((d_out, B), jnp.float32),
        grid=grid,
        in_specs=[
            pl.BlockSpec((d_in, tb), lambda i: (0, i)),       # x^T batch tile
            pl.BlockSpec((h_dim, d_in), lambda i: (0, 0)),    # W1^T (resident)
            pl.BlockSpec((h_dim, 1), lambda i: (0, 0)),       # b1
            pl.BlockSpec((d_out, h_dim), lambda i: (0, 0)),   # W2^T (resident)
            pl.BlockSpec((d_out, 1), lambda i: (0, 0)),       # b2_eff
        ],
        out_specs=pl.BlockSpec((d_out, tb), lambda i: (0, i)),
        compiler_params=pltpu.CompilerParams(
            dimension_semantics=("parallel",)),
    )(xt, w1t, b1c, w2t, b2_eff)

    return out_t.T                                                     # (B, D_out)


def init_params(key):
    """Deterministic init mimicking nn.Linear default (uniform +/- 1/sqrt(fan_in))."""
    k1, k2, k3, k4 = jax.random.split(key, 4)
    lim1 = 1.0 / jnp.sqrt(jnp.float32(D_IN))
    lim2 = 1.0 / jnp.sqrt(jnp.float32(H))
    # stored as (in, out): equivalent to torch weight (out, in) transposed
    w1 = jax.random.uniform(k1, (D_IN, H), jnp.float32, -lim1, lim1)
    b1 = jax.random.uniform(k2, (H,), jnp.float32, -lim1, lim1)
    w2 = jax.random.uniform(k3, (H, D_OUT), jnp.float32, -lim2, lim2)
    b2 = jax.random.uniform(k4, (D_OUT,), jnp.float32, -lim2, lim2)
    # my_useless_bias + 3 more_of_my_useless_biases, all initialized to ones(1, H)
    useless = [jnp.ones((1, H), jnp.float32) for _ in range(4)]
    return w1, b1, useless, w2, b2


def reference_forward(x, w1, b1, useless_biases, w2, b2):
    """Literal (un-folded, f32) reference matching the PyTorch forward."""
    h = jnp.maximum(x @ w1 + b1, 0.0)
    for b in useless_biases:
        h = h + b
    logits = h @ w2 + b2
    return jax.nn.softmax(logits, axis=-1)


if __name__ == "__main__":
    key = jax.random.PRNGKey(0)
    kx, kp = jax.random.split(key)
    x = jax.random.normal(kx, (BATCH, D_IN), jnp.float32)
    w1, b1, useless, w2, b2 = init_params(kp)

    out = my_module_forward(x, w1, b1, useless, w2, b2)
    out = jax.block_until_ready(out)

    ref = reference_forward(x, w1, b1, useless, w2, b2)
    assert out.shape == (BATCH, D_OUT)
    # exact-division softmax: rows sum to 1 to f32 precision
    assert jnp.allclose(jnp.sum(out, axis=-1), 1.0, atol=1e-4), \
        "softmax rows must sum to 1"
    # bf16 matmul operands vs pure-f32 reference -> loose tolerance
    assert jnp.allclose(out, ref, atol=2e-2), "mismatch vs pure-JAX reference"

    print("KERNEL_OK")
</pallas_src>

<mosaic_0001>
module attributes {stable_mosaic.version = 11 : i64} {
  func.func @_mlp_softmax_kernel(%arg0: i32, %arg1: memref<32x8xbf16, #tpu.memory_space<vmem>>, %arg2: memref<64x32xbf16, #tpu.memory_space<vmem>>, %arg3: memref<64x1xf32, #tpu.memory_space<vmem>>, %arg4: memref<16x64xbf16, #tpu.memory_space<vmem>>, %arg5: memref<16x1xf32, #tpu.memory_space<vmem>>, %arg6: memref<16x8xf32, #tpu.memory_space<vmem>>) attributes {dimension_semantics = [#tpu.dimension_semantics<parallel>], iteration_bounds = array<i64: 1>, scalar_prefetch = 0 : i64, scratch_operands = 0 : i64, tpu.core_type = #tpu.core_type<tc>, window_params = [{transform_indices = @transform_0, window_bounds = array<i64: 32, 8>}, {pipeline_mode = #tpu.pipeline_mode<synchronous>, transform_indices = @transform_1, window_bounds = array<i64: 64, 32>}, {pipeline_mode = #tpu.pipeline_mode<synchronous>, transform_indices = @transform_2, window_bounds = array<i64: 64, 1>}, {pipeline_mode = #tpu.pipeline_mode<synchronous>, transform_indices = @transform_3, window_bounds = array<i64: 16, 64>}, {pipeline_mode = #tpu.pipeline_mode<synchronous>, transform_indices = @transform_4, window_bounds = array<i64: 16, 1>}, {transform_indices = @transform_5, window_bounds = array<i64: 16, 8>}]} {
    %c0 = arith.constant 0 : index
    %c0_0 = arith.constant 0 : index
    %0 = vector.load %arg1[%c0, %c0_0] : memref<32x8xbf16, #tpu.memory_space<vmem>>, vector<32x8xbf16>
    %c0_1 = arith.constant 0 : index
    %c0_2 = arith.constant 0 : index
    %1 = vector.load %arg2[%c0_1, %c0_2] : memref<64x32xbf16, #tpu.memory_space<vmem>>, vector<64x32xbf16>
    %c0_3 = arith.constant 0 : index
    %c0_4 = arith.constant 0 : index
    %2 = vector.load %arg4[%c0_3, %c0_4] : memref<16x64xbf16, #tpu.memory_space<vmem>>, vector<16x64xbf16>
    %c0_5 = arith.constant 0 : index
    %c0_6 = arith.constant 0 : index
    %3 = vector.load %arg3[%c0_5, %c0_6] : memref<64x1xf32, #tpu.memory_space<vmem>>, vector<64x1xf32>
    %c0_7 = arith.constant 0 : index
    %c0_8 = arith.constant 0 : index
    %4 = vector.load %arg5[%c0_7, %c0_8] : memref<16x1xf32, #tpu.memory_space<vmem>>, vector<16x1xf32>
    %cst = arith.constant dense<0.000000e+00> : vector<64x8xf32>
    %5 = tpu.matmul %1, %0, %cst {dimension_numbers = #tpu.dot_dimension_numbers<[1], [0], [0], [1], [0, 0, 1, 1], [], []>} : vector<64x32xbf16>, vector<32x8xbf16>, vector<64x8xf32> -> vector<64x8xf32>
    %6 = vector.broadcast %3 : vector<64x1xf32> to vector<64x8xf32>
    %7 = arith.addf %5, %6 : vector<64x8xf32>
    %cst_9 = arith.constant 0.000000e+00 : f32
    %8 = vector.broadcast %cst_9 : f32 to vector<64x8xf32>
    %9 = arith.maximumf %7, %8 : vector<64x8xf32>
    %10 = arith.truncf %9 : vector<64x8xf32> to vector<64x8xbf16>
    %cst_10 = arith.constant dense<0.000000e+00> : vector<16x8xf32>
    %11 = tpu.matmul %2, %10, %cst_10 {dimension_numbers = #tpu.dot_dimension_numbers<[1], [0], [0], [1], [0, 0, 1, 1], [], []>} : vector<16x64xbf16>, vector<64x8xbf16>, vector<16x8xf32> -> vector<16x8xf32>
    %12 = vector.broadcast %4 : vector<16x1xf32> to vector<16x8xf32>
    %13 = arith.addf %11, %12 : vector<16x8xf32>
    %cst_11 = arith.constant dense<0xFF800000> : vector<8xf32>
    %14 = vector.multi_reduction <maximumf>, %13, %cst_11 [0] : vector<16x8xf32> to vector<8xf32>
    %15 = vector.shape_cast %14 : vector<8xf32> to vector<1x8xf32>
    %16 = vector.broadcast %15 : vector<1x8xf32> to vector<16x8xf32>
    %17 = arith.subf %13, %16 : vector<16x8xf32>
    %18 = math.exp %17 : vector<16x8xf32>
    %cst_12 = arith.constant dense<0.000000e+00> : vector<8xf32>
    %19 = vector.multi_reduction <add>, %18, %cst_12 [0] : vector<16x8xf32> to vector<8xf32>
    %20 = vector.shape_cast %19 : vector<8xf32> to vector<1x8xf32>
    %21 = vector.broadcast %20 : vector<1x8xf32> to vector<16x8xf32>
    %22 = arith.divf %18, %21 : vector<16x8xf32>
    %c0_13 = arith.constant 0 : index
    %c0_14 = arith.constant 0 : index
    %23 = vector.load %arg6[%c0_13, %c0_14] : memref<16x8xf32, #tpu.memory_space<vmem>>, vector<16x8xf32>
    tpu.vector_store %arg6[%c0_13, %c0_14], %22 {strides = array<i32>} : memref<16x8xf32, #tpu.memory_space<vmem>>, vector<16x8xf32>,
    return
  }
  func.func @transform_0(%arg0: i32) -> (i32, i32) {
    %c0_i32 = arith.constant 0 : i32
    %c0_i32_0 = arith.constant 0 : i32
    return %c0_i32, %arg0 : i32, i32
  }
  func.func @transform_1(%arg0: i32) -> (i32, i32) {
    %c0_i32 = arith.constant 0 : i32
    %c0_i32_0 = arith.constant 0 : i32
    %c0_i32_1 = arith.constant 0 : i32
    return %c0_i32, %c0_i32_0 : i32, i32
  }
  func.func @transform_2(%arg0: i32) -> (i32, i32) {
    %c0_i32 = arith.constant 0 : i32
    %c0_i32_0 = arith.constant 0 : i32
    %c0_i32_1 = arith.constant 0 : i32
    return %c0_i32, %c0_i32_0 : i32, i32
  }
  func.func @transform_3(%arg0: i32) -> (i32, i32) {
    %c0_i32 = arith.constant 0 : i32
    %c0_i32_0 = arith.constant 0 : i32
    %c0_i32_1 = arith.constant 0 : i32
    return %c0_i32, %c0_i32_0 : i32, i32
  }
  func.func @transform_4(%arg0: i32) -> (i32, i32) {
    %c0_i32 = arith.constant 0 : i32
    %c0_i32_0 = arith.constant 0 : i32
    %c0_i32_1 = arith.constant 0 : i32
    return %c0_i32, %c0_i32_0 : i32, i32
  }
  func.func @transform_5(%arg0: i32) -> (i32, i32) {
    %c0_i32 = arith.constant 0 : i32
    %c0_i32_0 = arith.constant 0 : i32
    return %c0_i32, %arg0 : i32, i32
  }
}

</mosaic_0001>

<bundles_post_ra>
// kernel: tpu_custom_call.1
= control target key start
LH: loop header
LB: loop body
LE: loop exit
PB: predicated region body
PF: predicated region fallthrough
CT: control target
= control target key end

     0   :  { %v366_v1 = vmov 0   ;;  %vm117_vm0 = vcmask 261120   ;;  %v367_v17 = vmov 0.0   ;;  %vm368_vm1 = vmmov 0   ;;  %s466_s0 = inlined_call_operand.vmem [shape: bf16[32,8], index: 0, kind: input, shape index: {}]   ;;  %s467_s1 = inlined_call_operand.vmem [shape: bf16[64,32], index: 1, kind: input, shape index: {}]   ;;  %s468_s2 = inlined_call_operand.vmem [shape: f32[64,1], index: 2, kind: input, shape index: {}]   ;;  %s469_s4 = inlined_call_operand.vmem [shape: f32[16,1], index: 4, kind: input, shape index: {}]   ;;  %s470_s3 = inlined_call_operand.vmem [shape: bf16[16,64], index: 3, kind: input, shape index: {}]   ;;  %s471_s5 = inlined_call_operand.vmem [shape: f32[16,8], index: 5, kind: output, shape index: {}]  }
   0x1   :  { %v353_v0 = vld [vmem:[%s466_s0] sm:$0xff]   ;;  %351 = vset.pattern.permute.xlu0 %v366_v1  ;;  %352 = vset.pattern.permute.xlu1 %v366_v1  ;;  %v354_v2 = vld [vmem:[%s466_s0 + $0x8] sm:$0xff]   ;;  %v37_v6 = vld [vmem:[%s468_s2 + $0x10] sm:$0xff]  ;;  %vm222_vm2 = vcmask 523264   ;;  %vm267_vm3 = vcmask 64512  }
   0x2   :  { %324 = vmatprep.subr.bf16.mxu0 %v353_v0  ;;  %v355_v3 = vld [vmem:[%s467_s1] sm:$0xff]   ;;  %v356_v4 = vld [vmem:[%s467_s1 + $0x8] sm:$0xff]   ;;  %v357_v7 = vld [vmem:[%s467_s1 + $0x10] sm:$0xff]   ;;  %57 = vperm.xlu1 %352, %v37_v6  }
   0x3   :  { %325 = vmatpush3.bf16.msra.mxu0 %v353_v0  ;;  %328 = vmatprep.mubr.msk.bf16.mxu0 %vm117_vm0, %v355_v3  ;;  %v35_v5 = vld [vmem:[%s468_s2] sm:$0xff]  ;;  %v36_v8 = vld [vmem:[%s468_s2 + $0x8] sm:$0xff]  ;;  %v38_v9 = vld [vmem:[%s468_s2 + $0x18] sm:$0xff] }
   0x4   :  { %326 = vmatprep.subr.bf16.mxu0 %v354_v2  ;;  %47 = vperm.xlu0 %351, %v35_v5   ;;  %v39_v10 = vld [vmem:[%s468_s2 + $0x20] sm:$0xff]  ;;  %v40_v11 = vld [vmem:[%s468_s2 + $0x28] sm:$0xff]  ;;  %v358_v12 = vld [vmem:[%s467_s1 + $0x18] sm:$0xff]  }
   0x5   :  { %v41_v13 = vld [vmem:[%s468_s2 + $0x30] sm:$0xff]  ;;  %v42_v14 = vld [vmem:[%s468_s2 + $0x38] sm:$0xff]  ;;  %v43_v15 = vld [vmem:[%s469_s4] sm:$0xff]  ;;  %336 = vmatprep.subr.bf16.mxu1 %v367_v17  ;;  %344 = vmatprep.mubr.msk.bf16.mxu1 %vm368_vm1, %v367_v17 }
   0x6   :  { %62 = vperm.xlu1 %352, %v38_v9   ;;  %v44_v16 = vld [vmem:[%s469_s4 + $0x8] sm:$0xff]  ;;  %v359_v54 = vld [vmem:[%s470_s3] sm:$0xff]  }
   0x7   :  { %327 = vmatpush3.bf16.msra.mxu0 %v354_v2 }
   0x8   :  { %52 = vperm.xlu0 %351, %v36_v8  }
   0xa   :  { %329 = vmatmul.mubr.msk.bf16.vlgmr.msra.gmra.mrb[0].mxu0 %vm117_vm0, %v356_v4  ;;  %72 = vperm.xlu1 %352, %v40_v11  }
   0xb   :  { %332 = vmatprep.mubr.msk.bf16.mxu0 %vm117_vm0, %v357_v7 }
   0xc   :  { %67 = vperm.xlu0 %351, %v39_v10  }
   0xe   :  { %82 = vperm.xlu1 %352, %v42_v14  }
  0x10   :  { %77 = vperm.xlu0 %351, %v41_v13  }
  0x12   :  { %333 = vmatmul.mubr.msk.bf16.gmra.mrb[4].mxu0 %vm117_vm0, %v358_v12  ;;  %214 = vperm.xlu1 %352, %v44_v16  }
  0x14   :  { %209 = vperm.xlu0 %351, %v43_v15  }
  0x81   :  { %v58_v19 = vpop.permute.xlu1 %57 }
  0x83   :  { %v48_v18 = vpop.permute.xlu0 %47 }
  0x85   :  { %v63_v21 = vpop.permute.xlu1 %62 }
  0x87   :  { %v53_v20 = vpop.permute.xlu0 %52 }
  0x89   :  { %v73_v30 = vpop.permute.xlu1 %72 }
  0x8b   :  { %v68_v25 = vpop.permute.xlu0 %67 }
  0x8d   :  { %v83_v42 = vpop.permute.xlu1 %82 }
  0x8f   :  { %v78_v37 = vpop.permute.xlu0 %77 }
  0x91   :  { %v215_v59 = vpop.permute.xlu1 %214 }
  0x93   :  { %v210_v55 = vpop.permute.xlu0 %209 }
  0xdd   :  { %v330_v22 = vpop.f32.mrb[0].mxu0 }
  0xde   :  { %v173_v23 = vadd.f32 %v330_v22, %v58_v19  ;;  %v164_v24 = vpop.f32.mrb[1].mxu0 }
  0xdf   :  { %v165_v26 = vadd.f32 %v164_v24, %v48_v18  ;;  %v331_v27 = vpop.f32.mrb[2].mxu0 }
  0xe0   :  { %v176_v28 = vadd.f32 %v331_v27, %v63_v21  ;;  %v167_v29 = vpop.f32.mrb[3].mxu0  ;;  %v197_v32 = vmax.f32 %v173_v23, 0.0 }
  0xe1   :  { %v168_v31 = vadd.f32 %v167_v29, %v53_v20  ;;  %v195_v34 = vmax.f32 %v165_v26, 0.0 }
  0xe2   :  { %v198_v33 = vmax.f32 %v176_v28, 0.0 }
  0xe3   :  { %v196_v35 = vmax.f32 %v168_v31, 0.0 }
  0xe4   :  { %v204_v36 = vpack.c.bf16 %v198_v33, %v197_v32 }
  0xe5   :  { %v334_v38 = vpop.f32.mrb[4].mxu0  ;;  %v203_v39 = vpack.c.bf16 %v196_v35, %v195_v34 }
  0xe6   :  { %v189_v40 = vadd.f32 %v334_v38, %v78_v37  ;;  %v180_v41 = vpop.f32.mrb[5].mxu0 }
  0xe7   :  { %v181_v43 = vadd.f32 %v180_v41, %v68_v25  ;;  %v335_v44 = vpop.f32.mrb[6].mxu0  ;;  %337 = vmatpush3.bf16.msra.mxu1 %v203_v39 }
  0xe8   :  { %v192_v45 = vadd.f32 %v335_v44, %v83_v42  ;;  %v183_v46 = vpop.f32.mrb[7].mxu0  ;;  %338 = vmatprep.subr.bf16.mxu1 %v367_v17  ;;  %v201_v48 = vmax.f32 %v189_v40, 0.0 }
  0xe9   :  { %v184_v47 = vadd.f32 %v183_v46, %v73_v30  ;;  %v199_v50 = vmax.f32 %v181_v43, 0.0 }
  0xea   :  { %v202_v49 = vmax.f32 %v192_v45, 0.0 }
  0xeb   :  { %v200_v51 = vmax.f32 %v184_v47, 0.0  ;;  %339 = vmatpush3.bf16.msra.mxu1 %v204_v36 }
  0xec   :  { %v206_v52 = vpack.c.bf16 %v202_v49, %v201_v48  ;;  %340 = vmatprep.subr.bf16.mxu1 %v367_v17 }
  0xed   :  { %v205_v53 = vpack.c.bf16 %v200_v51, %v199_v50 }
  0xef   :  { %341 = vmatpush3.bf16.msra.mxu1 %v205_v53 }
  0xf0   :  { %342 = vmatprep.subr.bf16.mxu1 %v367_v17 }
  0xf3   :  { %343 = vmatpush3.bf16.msra.mxu1 %v206_v52 }
  0xf6   :  { %345 = vmatmul.mubr.msk.bf16.vlgmr.msra.gmra.mrb[0].mxu1 %vm222_vm2, %v359_v54 }
 0x1c9   :  { %v260_v56 = vpop.f32.mrb[0].mxu1 }
 0x1ca   :  { %v261_v57 = vadd.f32 %v260_v56, %v210_v55  ;;  %v346_v58 = vpop.f32.mrb[1].mxu1 }
 0x1cb   :  { %v263_v60 = vpop.f32.mrb[2].mxu1 }
 0x1cc   :  { %v264_v61 = vadd.f32 %v263_v60, %v215_v59  ;;  %v347_v62 = vpop.f32.mrb[3].mxu1  ;;  %v268_v63 = vsel %vm267_vm3, %v261_v57, -inf }
 0x1ce   :  { %v269_v0 = vsel %vm267_vm3, %v264_v61, -inf }
 0x1cf   :  { %v270_v1 = vmax.f32 %v268_v63, %v269_v0 }
 0x1d1   :  { %v271_v2 = vrot.slane %v270_v1, 4 }
 0x1d3   :  { %v272_v3 = vmax.f32 %v270_v1, %v271_v2 }
 0x1d5   :  { %v273_v4 = vrot.slane %v272_v3, 2 }
 0x1d7   :  { %v274_v5 = vmax.f32 %v272_v3, %v273_v4 }
 0x1d9   :  { %v275_v6 = vrot.slane %v274_v5, 1 }
 0x1db   :  { %v276_v7 = vmax.f32 %v274_v5, %v275_v6 }
 0x1dd   :  { %v277_v8 = vsub.f32 %v261_v57, %v276_v7  ;;  %v278_v9 = vsub.f32 %v264_v61, %v276_v7 }
 0x1df   :  { %v279_v10 = vmul.f32 1.442695, %v277_v8  ;;  %v281_v11 = vmul.f32 1.442695, %v278_v9 }
 0x1e1   :  { %360 = vpow2.f32 %v279_v10 }
 0x1e2   :  { %362 = vpow2.f32 %v281_v11 }
 0x1eb   :  { %v361_v12 = vpop.eup %360 }
 0x1ec   :  { %v363_v13 = vpop.eup %362  ;;  %v283_v14 = vsel %vm267_vm3, %v361_v12, 0.0 }
 0x1ed   :  { %v284_v15 = vsel %vm267_vm3, %v363_v13, 0.0 }
 0x1ee   :  { %v285_v16 = vadd.f32 %v284_v15, %v283_v14 }
 0x1f0   :  { %v286_v17 = vrot.slane %v285_v16, 4 }
 0x1f2   :  { %v287_v18 = vadd.f32 %v286_v17, %v285_v16 }
 0x1f4   :  { %v288_v19 = vrot.slane %v287_v18, 2 }
 0x1f6   :  { %v289_v20 = vadd.f32 %v288_v19, %v287_v18 }
 0x1f8   :  { %v290_v21 = vrot.slane %v289_v20, 1 }
 0x1fa   :  { %v291_v22 = vadd.f32 %v290_v21, %v289_v20 }
 0x1fc   :  { %364 = vrcp.f32 %v291_v22 }
 0x206   :  { %v365_v23 = vpop.eup %364 }
 0x207   :  { %v293_v24 = vmul.f32 %v365_v23, %v361_v12  ;;  %v294_v25 = vmul.f32 %v365_v23, %v363_v13 }
 0x209   :  { %295 = vst.msk [vmem:[%s471_s5] sm:$0xff] %vm267_vm3, %v293_v24  ;;  %296 = vst.msk [vmem:[%s471_s5 + $0x8] sm:$0xff] %vm267_vm3, %v294_v25 }

</bundles_post_ra>
